<compile_context>
chip_gen: v7x
topology: tpu7x:2x2x1
jax: 0.10.0
libtpu: 0.0.40
codegen_flags: <defaults>
</compile_context>

<pallas_src>
import functools

import jax
import jax.numpy as jnp
from jax.experimental import pallas as pl
from jax.experimental.pallas import tpu as pltpu


def _layernorm_kernel(x_ref, g_ref, b_ref, o_ref, *, feat, eps):
    # x tile: (Bt, F, TN) -- tokens on lanes, features on sublanes.
    x = x_ref[...].astype(jnp.float32)

    # Single pass: only `x` (needed for the output anyway) stays live across
    # the reductions; no materialized (x - mean) full-tile temporary.
    s1 = jnp.sum(x, axis=1, keepdims=True)                 # (Bt, 1, TN)
    s2 = jnp.sum(x * x, axis=1, keepdims=True)             # (Bt, 1, TN)
    mean = s1 * (1.0 / feat)

    # torch.std() is unbiased (ddof = 1).  F == 1 is degenerate (torch -> NaN).
    var = (s2 - feat * (mean * mean)) * (1.0 / max(feat - 1, 1))
    var = jnp.maximum(var, 0.0)                            # guard fp cancellation

    # Exact 1/(std + eps): matches the PyTorch formulation (eps added to std).
    inv = pl.reciprocal(jnp.sqrt(var) + eps, approx=False)

    y = g_ref[...] * ((x - mean) * inv) + b_ref[...]       # (1,F,1) broadcast
    o_ref[...] = y.astype(o_ref.dtype)


def layer_norm(x, a_2, b_2, eps=1e-6, target_tile_bytes=2 << 20):
    """Channels-first LayerNorm.  x: (B, F, N); a_2/b_2: (F,).  Returns (B, F, N)."""
    B, F, N = x.shape
    itemsize = jnp.dtype(x.dtype).itemsize

    # ---- token (lane) tile: sized by bytes; prefer tn == N (contiguous DMA). ----
    per_batch_bytes = F * N * itemsize
    if per_batch_bytes <= target_tile_bytes or N <= 128:
        tn = N
    else:
        tn = int(target_tile_bytes // (F * itemsize)) // 128 * 128
        tn = max(128, min(tn, (N // 128) * 128))

    # ---- fold batch elements into the block while the tile stays small. ----
    bt = 1
    if tn == N:
        bt = int(max(1, min(B, target_tile_bytes // max(F * tn * itemsize, 1))))

    # ---- v7x megacore: keep >= 2 "parallel" grid steps when there is real work. ----
    total_bytes = B * per_batch_bytes
    if total_bytes > (4 << 20) and pl.cdiv(B, bt) * pl.cdiv(N, tn) < 2:
        if B > 1:
            bt = (B + 1) // 2
        elif N >= 256:
            tn = max(128, ((N // 2) // 128) * 128)

    grid = (pl.cdiv(B, bt), pl.cdiv(N, tn))

    gamma = a_2.reshape(1, F, 1).astype(jnp.float32)
    beta = b_2.reshape(1, F, 1).astype(jnp.float32)

    # ---- generation-aware VMEM budget: 2x-buffered in/out tiles + f32 scratch. ----
    tile_bytes = bt * F * tn * itemsize
    f32_tile_bytes = bt * F * tn * 4
    try:
        phys_vmem = int(pltpu.get_tpu_info().vmem_capacity_bytes)
    except Exception:
        phys_vmem = 64 << 20                       # conservative (v7x-sized) fallback
    vmem_cap = (3 * phys_vmem) // 4                # ~48 MiB on v7x, ~96 MiB on v5e/v6e
    need = 4 * tile_bytes + 3 * f32_tile_bytes + (2 << 20)
    vmem_bytes = int(min(max(need, 16 << 20), vmem_cap))

    return pl.pallas_call(
        functools.partial(_layernorm_kernel, feat=F, eps=eps),
        out_shape=jax.ShapeDtypeStruct((B, F, N), x.dtype),
        grid=grid,
        in_specs=[
            pl.BlockSpec((bt, F, tn), lambda b, n: (b, 0, n)),   # x tile
            pl.BlockSpec((1, F, 1), lambda b, n: (0, 0, 0)),     # a_2 (gamma)
            pl.BlockSpec((1, F, 1), lambda b, n: (0, 0, 0)),     # b_2 (beta)
        ],
        out_specs=pl.BlockSpec((bt, F, tn), lambda b, n: (b, 0, n)),
        compiler_params=pltpu.CompilerParams(
            dimension_semantics=("parallel", "parallel"),
            vmem_limit_bytes=vmem_bytes,
        ),
    )(x, gamma, beta)


# ---------------- pure-JAX reference (mirrors the PyTorch code) ----------------
def ref_layer_norm(x, a_2, b_2, eps=1e-6):
    mean = jnp.mean(x, axis=-2, keepdims=True)
    std = jnp.std(x, axis=-2, ddof=1, keepdims=True)       # torch.std is unbiased
    return (a_2.reshape(1, -1, 1) * ((x - mean) / (std + eps))
            + b_2.reshape(1, -1, 1))


if __name__ == "__main__":
    key = jax.random.PRNGKey(0)
    kx, kg, kb, kx2, kg2, kb2 = jax.random.split(key, 6)

    # Small, module-consistent shape: batch=2, features=64, tokens=256.
    B, F, N = 2, 64, 256
    x = jax.random.normal(kx, (B, F, N), jnp.float32)
    a_2 = 1.0 + 0.1 * jax.random.normal(kg, (F,), jnp.float32)
    b_2 = 0.1 * jax.random.normal(kb, (F,), jnp.float32)

    out = jax.block_until_ready(layer_norm(x, a_2, b_2))
    ref = ref_layer_norm(x, a_2, b_2)
    assert out.shape == (B, F, N)
    err = float(jnp.max(jnp.abs(out - ref)))
    assert jnp.allclose(out, ref, rtol=1e-3, atol=1e-3), f"max abs err = {err}"

    # Also exercise the token-tiled path (tn < N, multi-step grid).
    B2, F2, N2 = 1, 512, 2048
    x2 = jax.random.normal(kx2, (B2, F2, N2), jnp.float32)
    g2 = 1.0 + 0.1 * jax.random.normal(kg2, (F2,), jnp.float32)
    s2 = 0.1 * jax.random.normal(kb2, (F2,), jnp.float32)
    out2 = jax.block_until_ready(layer_norm(x2, g2, s2))
    ref2 = ref_layer_norm(x2, g2, s2)
    err2 = float(jnp.max(jnp.abs(out2 - ref2)))
    assert jnp.allclose(out2, ref2, rtol=1e-3, atol=1e-3), f"max abs err = {err2}"

    print("KERNEL_OK")
</pallas_src>

<mosaic_0001>
module attributes {stable_mosaic.version = 11 : i64} {
  func.func @_layernorm_kernel(%arg0: i32, %arg1: i32, %arg2: memref<2x64x256xf32, #tpu.memory_space<vmem>>, %arg3: memref<1x64x1xf32, #tpu.memory_space<vmem>>, %arg4: memref<1x64x1xf32, #tpu.memory_space<vmem>>, %arg5: memref<2x64x256xf32, #tpu.memory_space<vmem>>) attributes {dimension_semantics = [#tpu.dimension_semantics<parallel>, #tpu.dimension_semantics<parallel>], iteration_bounds = array<i64: 1, 1>, scalar_prefetch = 0 : i64, scratch_operands = 0 : i64, tpu.core_type = #tpu.core_type<tc>, window_params = [{transform_indices = @transform_0, window_bounds = array<i64: 2, 64, 256>}, {pipeline_mode = #tpu.pipeline_mode<synchronous>, transform_indices = @transform_1, window_bounds = array<i64: 1, 64, 1>}, {pipeline_mode = #tpu.pipeline_mode<synchronous>, transform_indices = @transform_2, window_bounds = array<i64: 1, 64, 1>}, {transform_indices = @transform_3, window_bounds = array<i64: 2, 64, 256>}]} {
    %c0 = arith.constant 0 : index
    %c0_0 = arith.constant 0 : index
    %c0_1 = arith.constant 0 : index
    %0 = vector.load %arg2[%c0, %c0_0, %c0_1] : memref<2x64x256xf32, #tpu.memory_space<vmem>>, vector<2x64x256xf32>
    %cst = arith.constant dense<0.000000e+00> : vector<2x256xf32>
    %1 = vector.multi_reduction <add>, %0, %cst [1] : vector<2x64x256xf32> to vector<2x256xf32>
    %2 = vector.shape_cast %1 : vector<2x256xf32> to vector<2x1x256xf32>
    %3 = arith.mulf %0, %0 : vector<2x64x256xf32>
    %cst_2 = arith.constant dense<0.000000e+00> : vector<2x256xf32>
    %4 = vector.multi_reduction <add>, %3, %cst_2 [1] : vector<2x64x256xf32> to vector<2x256xf32>
    %5 = vector.shape_cast %4 : vector<2x256xf32> to vector<2x1x256xf32>
    %cst_3 = arith.constant 1.562500e-02 : f32
    %6 = vector.broadcast %cst_3 : f32 to vector<2x1x256xf32>
    %7 = arith.mulf %2, %6 : vector<2x1x256xf32>
    %8 = arith.mulf %7, %7 : vector<2x1x256xf32>
    %cst_4 = arith.constant 6.400000e+01 : f32
    %9 = vector.broadcast %cst_4 : f32 to vector<2x1x256xf32>
    %10 = arith.mulf %9, %8 : vector<2x1x256xf32>
    %11 = arith.subf %5, %10 : vector<2x1x256xf32>
    %cst_5 = arith.constant 0.0158730168 : f32
    %12 = vector.broadcast %cst_5 : f32 to vector<2x1x256xf32>
    %13 = arith.mulf %11, %12 : vector<2x1x256xf32>
    %cst_6 = arith.constant 0.000000e+00 : f32
    %14 = vector.broadcast %cst_6 : f32 to vector<2x1x256xf32>
    %15 = arith.maximumf %13, %14 : vector<2x1x256xf32>
    %16 = math.sqrt %15 : vector<2x1x256xf32>
    %cst_7 = arith.constant 9.99999997E-7 : f32
    %17 = vector.broadcast %cst_7 : f32 to vector<2x1x256xf32>
    %18 = arith.addf %16, %17 : vector<2x1x256xf32>
    %19 = tpu.reciprocal %18 : vector<2x1x256xf32> -> vector<2x1x256xf32>
    %c0_8 = arith.constant 0 : index
    %c0_9 = arith.constant 0 : index
    %c0_10 = arith.constant 0 : index
    %20 = vector.load %arg3[%c0_8, %c0_9, %c0_10] : memref<1x64x1xf32, #tpu.memory_space<vmem>>, vector<1x64x1xf32>
    %21 = vector.broadcast %7 : vector<2x1x256xf32> to vector<2x64x256xf32>
    %22 = arith.subf %0, %21 : vector<2x64x256xf32>
    %23 = vector.broadcast %19 : vector<2x1x256xf32> to vector<2x64x256xf32>
    %24 = arith.mulf %22, %23 : vector<2x64x256xf32>
    %25 = vector.broadcast %20 : vector<1x64x1xf32> to vector<2x64x256xf32>
    %26 = arith.mulf %25, %24 : vector<2x64x256xf32>
    %c0_11 = arith.constant 0 : index
    %c0_12 = arith.constant 0 : index
    %c0_13 = arith.constant 0 : index
    %27 = vector.load %arg4[%c0_11, %c0_12, %c0_13] : memref<1x64x1xf32, #tpu.memory_space<vmem>>, vector<1x64x1xf32>
    %28 = vector.broadcast %27 : vector<1x64x1xf32> to vector<2x64x256xf32>
    %29 = arith.addf %26, %28 : vector<2x64x256xf32>
    %c0_14 = arith.constant 0 : index
    %c0_15 = arith.constant 0 : index
    %c0_16 = arith.constant 0 : index
    %30 = vector.load %arg5[%c0_14, %c0_15, %c0_16] : memref<2x64x256xf32, #tpu.memory_space<vmem>>, vector<2x64x256xf32>
    tpu.vector_store %arg5[%c0_14, %c0_15, %c0_16], %29 {strides = array<i32>} : memref<2x64x256xf32, #tpu.memory_space<vmem>>, vector<2x64x256xf32>,
    return
  }
  func.func @transform_0(%arg0: i32, %arg1: i32) -> (i32, i32, i32) {
    %c0_i32 = arith.constant 0 : i32
    %c0_i32_0 = arith.constant 0 : i32
    return %arg0, %c0_i32, %arg1 : i32, i32, i32
  }
  func.func @transform_1(%arg0: i32, %arg1: i32) -> (i32, i32, i32) {
    %c0_i32 = arith.constant 0 : i32
    %c0_i32_0 = arith.constant 0 : i32
    %c0_i32_1 = arith.constant 0 : i32
    %c0_i32_2 = arith.constant 0 : i32
    return %c0_i32, %c0_i32_0, %c0_i32_1 : i32, i32, i32
  }
  func.func @transform_2(%arg0: i32, %arg1: i32) -> (i32, i32, i32) {
    %c0_i32 = arith.constant 0 : i32
    %c0_i32_0 = arith.constant 0 : i32
    %c0_i32_1 = arith.constant 0 : i32
    %c0_i32_2 = arith.constant 0 : i32
    return %c0_i32, %c0_i32_0, %c0_i32_1 : i32, i32, i32
  }
  func.func @transform_3(%arg0: i32, %arg1: i32) -> (i32, i32, i32) {
    %c0_i32 = arith.constant 0 : i32
    %c0_i32_0 = arith.constant 0 : i32
    return %arg0, %c0_i32, %arg1 : i32, i32, i32
  }
}

</mosaic_0001>

<bundles_post_ra>
// kernel: tpu_custom_call.1
= control target key start
LH: loop header
LB: loop body
LE: loop exit
PB: predicated region body
PF: predicated region fallthrough
CT: control target
= control target key end

     0   :  { %8 = vsyncpa [#allocation3], 0  ;;  %s1022_s0 = inlined_call_operand.hbm [shape: f32[2,64,256], index: 0, kind: input, shape index: {}]   ;;  %s1023_s1 = inlined_call_operand.vmem [shape: f32[1,64,1], index: 1, kind: input, shape index: {}]   ;;  %s1024_s2 = inlined_call_operand.vmem [shape: f32[1,64,1], index: 2, kind: input, shape index: {}]   ;;  %s1025_s3 = inlined_call_operand.hbm [shape: f32[2,64,256], index: 3, kind: output, shape index: {}]  }
   0x1   :  { %9 = vsyncpa [#allocation4], 0  ;;  %s601_s12 = smov [#allocation2]   ;;  %s553_s16 = scalar_lea.hbm %s1022_s0, 4096 }
   0x2   :  { %s15_s13 = sshll.u32 %s601_s12, 4  ;;  %p554_p0 = scmp.ne.s32.totalorder %s1022_s0, %s553_s16  ;;  %s16_s13 = int_to_ptr.vmem [resolvable:$true] %s15_s13 }
   0x3   :  { %p557_p1 = scmp.lt.u32.totalorder %s553_s16, %s1022_s0 }
   0x5   :  { %p559_p2 = pnand %p557_p1, %p554_p0 }
   0x7   :  { %562 = shalt.err (!%p559_p2)
}
   0x8   :  { %s563_s21 = scalar_lea.vmem %s16_s13, 4096  ;;  %p568_p4 = scmp.lt.s32.totalorder %s16_s13, %s16_s13 }
   0x9   :  { %p564_p3 = scmp.ne.s32.totalorder %s16_s13, %s563_s21  ;;  %p569_p5 = scmp.lt.s32.totalorder %s563_s21, %s563_s21 }
   0xb   :  { %p570_p6 = por %p569_p5, %p568_p4 }
   0xd   :  { %p571_p7 = pnand %p570_p6, %p564_p3 }
   0xf   :  { %574 = shalt.err (!%p571_p7)
}
  0x10   :  { %s602_s22 = smov 256   ;;  %s603_s23 = smov 16  }
  0x11   :  { %21 = dma.hbm_to_vmem [thread:$0]  %s1022_s0, 4096, %s16_s13, [#allocation3], %s602_s22, %s602_s22, %s603_s23  }
  0x12   :  { %597 = dma.done.wait [#allocation3], 4096  }
  0x13   :  { %598 = vsyncadd [#allocation3], 4294963200  ;;  %v604_v0 = vmov 0   ;;  %v259_v1 = vld [vmem:[%s1023_s1 + $0x10] sm:$0xff]  ;;  %v257_v2 = vld [vmem:[%s1023_s1] sm:$0xff] }
  0x14   :  { %536 = vset.pattern.permute.xlu1 %v604_v0  ;;  %535 = vset.pattern.permute.xlu0 %v604_v0  ;;  %v260_v3 = vld [vmem:[%s1023_s1 + $0x18] sm:$0xff]  ;;  %v258_v4 = vld [vmem:[%s1023_s1 + $0x8] sm:$0xff]  ;;  %v261_v6 = vld [vmem:[%s1023_s1 + $0x20] sm:$0xff] }
  0x15   :  { %341 = vperm.xlu1 %536, %v259_v1   ;;  %331 = vperm.xlu0 %535, %v257_v2   ;;  %v262_v5 = vld [vmem:[%s1023_s1 + $0x28] sm:$0xff]  ;;  %v264_v7 = vld [vmem:[%s1023_s1 + $0x38] sm:$0xff]  ;;  %v263_v8 = vld [vmem:[%s1023_s1 + $0x30] sm:$0xff] }
  0x16   :  { %v402_v9 = vld [vmem:[%s1024_s2 + $0x8] sm:$0xff]  ;;  %v401_v10 = vld [vmem:[%s1024_s2] sm:$0xff]  ;;  %v673_v12 = vld [vmem:[#allocation2 + $0x10] sm:$0xff] }
  0x17   :  { %v671_v11 = vld [vmem:[#allocation2] sm:$0xff]  ;;  %v404_v13 = vld [vmem:[%s1024_s2 + $0x18] sm:$0xff]  ;;  %v678_v14 = vld [vmem:[#allocation2 + $0x8] sm:$0xff]  ;;  %v115_v43 = vmul.f32 %v673_v12, %v673_v12 }
  0x18   :  { %v680_v15 = vld [vmem:[#allocation2 + $0x18] sm:$0xff]  ;;  %v403_v16 = vld [vmem:[%s1024_s2 + $0x10] sm:$0xff]  ;;  %v685_v17 = vld [vmem:[#allocation2 + $0x80] sm:$0xff]  ;;  %v61_v21 = vadd.f32 %v673_v12, %v671_v11  ;;  %v113_v42 = vmul.f32 %v671_v11, %v671_v11  ;;  %v114_v46 = vmul.f32 %v678_v14, %v678_v14 }
  0x19   :  { %346 = vperm.xlu1 %536, %v260_v3   ;;  %336 = vperm.xlu0 %535, %v258_v4   ;;  %v687_v18 = vld [vmem:[#allocation2 + $0x90] sm:$0xff]  ;;  %v689_v19 = vld [vmem:[#allocation2 + $0x88] sm:$0xff]  ;;  %v691_v20 = vld [vmem:[#allocation2 + $0x98] sm:$0xff]  ;;  %v74_v23 = vadd.f32 %v680_v15, %v678_v14  ;;  %v116_v47 = vmul.f32 %v680_v15, %v680_v15  ;;  %v129_v50 = vmul.f32 %v685_v17, %v685_v17 }
  0x1a   :  { %v695_v22 = vld [vmem:[#allocation2 + $0x20] sm:$0xff]  ;;  %v699_v24 = vld [vmem:[#allocation2 + $0x28] sm:$0xff]  ;;  %v87_v25 = vadd.f32 %v687_v18, %v685_v17  ;;  %v100_v29 = vadd.f32 %v691_v20, %v689_v19  ;;  %v716_v32 = vld [vmem:[#allocation2 + $0x30] sm:$0xff]  ;;  %v131_v51 = vmul.f32 %v687_v18, %v687_v18  ;;  %v130_v54 = vmul.f32 %v689_v19, %v689_v19 }
  0x1b   :  { %v406_v26 = vld [vmem:[%s1024_s2 + $0x28] sm:$0xff]  ;;  %v405_v27 = vld [vmem:[%s1024_s2 + $0x20] sm:$0xff]  ;;  %v62_v31 = vadd.f32 %v61_v21, %v695_v22  ;;  %v75_v33 = vadd.f32 %v74_v23, %v699_v24  ;;  %v719_v34 = vld [vmem:[#allocation2 + $0x38] sm:$0xff]  ;;  %v132_v55 = vmul.f32 %v691_v20, %v691_v20  ;;  %v117_v58 = vmul.f32 %v695_v22, %v695_v22 }
  0x1c   :  { %v709_v28 = vld [vmem:[#allocation2 + $0xa0] sm:$0xff]  ;;  %v713_v30 = vld [vmem:[#allocation2 + $0xa8] sm:$0xff]  ;;  %v408_v36 = vld [vmem:[%s1024_s2 + $0x38] sm:$0xff]  ;;  %v145_v59 = vadd.f32 %v115_v43, %v113_v42  ;;  %v118_v62 = vmul.f32 %v699_v24, %v699_v24  ;;  %v158_v63 = vadd.f32 %v116_v47, %v114_v46  ;;  %v171_v3 = vadd.f32 %v131_v51, %v129_v50 }
  0x1d   :  { %356 = vperm.xlu1 %536, %v262_v5   ;;  %351 = vperm.xlu0 %535, %v261_v6   ;;  %v88_v35 = vadd.f32 %v87_v25, %v709_v28  ;;  %v407_v37 = vld [vmem:[%s1024_s2 + $0x30] sm:$0xff]  ;;  %v101_v39 = vadd.f32 %v100_v29, %v713_v30  ;;  %v731_v40 = vld [vmem:[#allocation2 + $0xb8] sm:$0xff]  ;;  %v63_v41 = vadd.f32 %v62_v31, %v716_v32  ;;  %v738_v44 = vld [vmem:[#allocation2 + $0x40] sm:$0xff]  ;;  %s605_s2 = smov [#allocation5]  }
  0x1e   :  { %v728_v38 = vld [vmem:[#allocation2 + $0xb0] sm:$0xff]  ;;  %v76_v45 = vadd.f32 %v75_v33, %v719_v34  ;;  %v745_v48 = vld [vmem:[#allocation2 + $0x48] sm:$0xff]  ;;  %v752_v52 = vld [vmem:[#allocation2 + $0xc0] sm:$0xff]  ;;  %v133_v2 = vmul.f32 %v709_v28, %v709_v28  ;;  %v134_v6 = vmul.f32 %v713_v30, %v713_v30  ;;  %v120_v23 = vmul.f32 %v719_v34, %v719_v34  ;;  %s518_s4 = sshll.u32 %s605_s2, 4  ;;  %s519_s4 = int_to_ptr.vmem [resolvable:$true] %s518_s4 }
  0x1f   :  { %v89_v49 = vadd.f32 %v88_v35, %v728_v38  ;;  %v102_v53 = vadd.f32 %v101_v39, %v731_v40  ;;  %v759_v56 = vld [vmem:[#allocation2 + $0xc8] sm:$0xff]  ;;  %v64_v57 = vadd.f32 %v63_v41, %v738_v44  ;;  %v764_v60 = vld [vmem:[#allocation2 + $0x50] sm:$0xff]  ;;  %v769_v0 = vld [vmem:[#allocation2 + $0x58] sm:$0xff]  ;;  %v159_v25 = vadd.f32 %v158_v63, %v118_v62  ;;  %s575_s0 = scalar_lea.vmem %s519_s4, 4096  ;;  %p580_p9 = scmp.lt.s32.totalorder %s519_s4, %s519_s4 }
  0x20   :  { %v77_v61 = vadd.f32 %v76_v45, %v745_v48  ;;  %v774_v4 = vld [vmem:[#allocation2 + $0xd0] sm:$0xff]  ;;  %v135_v29 = vmul.f32 %v728_v38, %v728_v38  ;;  %v172_v31 = vadd.f32 %v171_v3, %v133_v2  ;;  %v794_v33 = vld [vmem:[#allocation2 + $0xe0] sm:$0xff]  ;;  %v799_v39 = vld [vmem:[#allocation2 + $0xe8] sm:$0xff]  ;;  %v121_v42 = vmul.f32 %v738_v44, %v738_v44  ;;  %p576_p8 = scmp.ne.s32.totalorder %s519_s4, %s575_s0  ;;  %p581_p10 = scmp.lt.s32.totalorder %s575_s0, %s575_s0 }
  0x21   :  { %366 = vperm.xlu1 %536, %v264_v7   ;;  %361 = vperm.xlu0 %535, %v263_v8   ;;  %v90_v1 = vadd.f32 %v89_v49, %v752_v52  ;;  %v103_v5 = vadd.f32 %v102_v53, %v759_v56  ;;  %v184_v7 = vadd.f32 %v132_v55, %v130_v54  ;;  %v779_v8 = vld [vmem:[#allocation2 + $0xd8] sm:$0xff]  ;;  %v804_v45 = vld [vmem:[#allocation2 + $0x70] sm:$0xff] }
  0x22   :  { %v78_v21 = vadd.f32 %v77_v61, %v769_v0  ;;  %1032 = vst [vmem:[#allocation10_spill] sm:$0xff] %v794_v33  ;;  %1033 = vst [vmem:[#allocation11_spill] sm:$0xff] %v799_v39  ;;  %v122_v47 = vmul.f32 %v745_v48, %v745_v48  ;;  %v160_v49 = vadd.f32 %v159_v25, %v120_v23  ;;  %v809_v50 = vld [vmem:[#allocation2 + $0x78] sm:$0xff]  ;;  %v814_v55 = vld [vmem:[#allocation2 + $0xf0] sm:$0xff]  ;;  %p582_p11 = por %p581_p10, %p580_p9 }
  0x23   :  { %v104_v35 = vadd.f32 %v103_v5, %v779_v8  ;;  %v137_v53 = vmul.f32 %v752_v52, %v752_v52  ;;  %v173_v54 = vadd.f32 %v172_v31, %v135_v29  ;;  %v819_v61 = vld [vmem:[#allocation2 + $0xf8] sm:$0xff]  ;;  %v123_v63 = vmul.f32 %v764_v60, %v764_v60 }
  0x24   :  { %v124_v3 = vmul.f32 %v769_v0, %v769_v0  ;;  %v161_v5 = vadd.f32 %v160_v49, %v122_v47  ;;  %v127_v49 = vmul.f32 %v804_v45, %v804_v45  ;;  %p583_p12 = pnand %p582_p11, %p576_p8 }
  0x25   :  { %416 = vperm.xlu1 %536, %v402_v9   ;;  %411 = vperm.xlu0 %535, %v401_v10   ;;  %v65_v9 = vadd.f32 %v64_v57, %v764_v60  ;;  %v119_v10 = vmul.f32 %v716_v32, %v716_v32  ;;  %v105_v57 = vadd.f32 %v104_v35, %v799_v39 }
  0x26   :  { %v162_v35 = vadd.f32 %v161_v5, %v124_v3  ;;  %v144_v3 = vmul.f32 %v819_v61, %v819_v61 }
  0x29   :  { %426 = vperm.xlu1 %536, %v404_v13   ;;  %421 = vperm.xlu0 %535, %v403_v16   ;;  %v146_v13 = vadd.f32 %v145_v59, %v117_v58  ;;  %v784_v16 = vld [vmem:[#allocation2 + $0x60] sm:$0xff]  ;;  %v138_v58 = vmul.f32 %v759_v56, %v759_v56 }
  0x2a   :  { %1030 = vst [vmem:[#allocation8_spill] sm:$0xff] %v784_v16  ;;  %v66_v41 = vadd.f32 %v65_v9, %v784_v16  ;;  %v174_v9 = vadd.f32 %v173_v54, %v137_v53  ;;  %v125_v25 = vmul.f32 %v784_v16, %v784_v16  ;;  %v128_v54 = vmul.f32 %v809_v50, %v809_v50 }
  0x2b   :  { %v147_v43 = vadd.f32 %v146_v13, %v119_v10  ;;  %v106_v10 = vadd.f32 %v105_v57, %v819_v61  ;;  %v140_v13 = vmul.f32 %v779_v8, %v779_v8 }
  0x2c   :  { %v67_v62 = vadd.f32 %v66_v41, %v804_v45 }
  0x2d   :  { %436 = vperm.xlu1 %536, %v406_v26   ;;  %431 = vperm.xlu0 %535, %v405_v27   ;;  %v789_v26 = vld [vmem:[#allocation2 + $0x68] sm:$0xff]  ;;  %v91_v27 = vadd.f32 %v90_v1, %v774_v4  ;;  %v148_v1 = vadd.f32 %v147_v43, %v121_v42  ;;  %v107_v42 = vrot.slane %v106_v10, 4  ;;  %v142_v43 = vmul.f32 %v799_v39, %v799_v39 }
  0x2e   :  { %1031 = vst [vmem:[#allocation9_spill] sm:$0xff] %v789_v26  ;;  %v79_v46 = vadd.f32 %v78_v21, %v789_v26  ;;  %v68_v23 = vrot.slane %v67_v62, 4  ;;  %v126_v31 = vmul.f32 %v789_v26, %v789_v26 }
  0x2f   :  { %v92_v51 = vadd.f32 %v91_v27, %v794_v33  ;;  %v149_v27 = vadd.f32 %v148_v1, %v123_v63  ;;  %v108_v1 = vadd.f32 %v107_v42, %v106_v10 }
  0x30   :  { %v80_v2 = vadd.f32 %v79_v46, %v809_v50  ;;  %v69_v47 = vadd.f32 %v68_v23, %v67_v62  ;;  %v163_v57 = vadd.f32 %v162_v35, %v126_v31 }
  0x31   :  { %446 = vperm.xlu1 %536, %v408_v36   ;;  %441 = vperm.xlu0 %535, %v407_v37   ;;  %v136_v36 = vmul.f32 %v731_v40, %v731_v40  ;;  %v185_v37 = vadd.f32 %v184_v7, %v134_v6  ;;  %v93_v6 = vadd.f32 %v92_v51, %v814_v55  ;;  %v109_v23 = vrot.slane %v108_v1, 2 }
  0x32   :  { %v139_v7 = vmul.f32 %v774_v4, %v774_v4  ;;  %v81_v29 = vrot.slane %v80_v2, 4  ;;  %v150_v51 = vadd.f32 %v149_v27, %v125_v25  ;;  %v70_v62 = vrot.slane %v69_v47, 2 }
  0x33   :  { %v186_v59 = vadd.f32 %v185_v37, %v136_v36  ;;  %v94_v36 = vrot.slane %v93_v6, 4  ;;  %v141_v37 = vmul.f32 %v794_v33, %v794_v33 }
  0x34   :  { %v175_v41 = vadd.f32 %v174_v9, %v139_v7  ;;  %v82_v53 = vadd.f32 %v81_v29, %v80_v2  ;;  %v151_v7 = vadd.f32 %v150_v51, %v127_v49  ;;  %v71_v27 = vadd.f32 %v70_v62, %v69_v47 }
  0x35   :  { %v187_v21 = vadd.f32 %v186_v59, %v138_v58  ;;  %v95_v58 = vadd.f32 %v94_v36, %v93_v6  ;;  %v143_v59 = vmul.f32 %v814_v55, %v814_v55 }
  0x36   :  { %v176_v63 = vadd.f32 %v175_v41, %v141_v37  ;;  %v83_v9 = vrot.slane %v82_v53, 2  ;;  %v152_v29 = vrot.slane %v151_v7, 4  ;;  %v110_v37 = vadd.f32 %v109_v23, %v108_v1 }
  0x37   :  { %v188_v46 = vadd.f32 %v187_v21, %v140_v13  ;;  %v164_v13 = vadd.f32 %v163_v57, %v128_v54  ;;  %v96_v21 = vrot.slane %v95_v58, 2  ;;  %v72_v41 = vrot.slane %v71_v27, 1 }
  0x38   :  { %v177_v2 = vadd.f32 %v176_v63, %v143_v59  ;;  %v84_v6 = vadd.f32 %v83_v9, %v82_v53  ;;  %v153_v42 = vadd.f32 %v152_v29, %v151_v7  ;;  %v111_v51 = vrot.slane %v110_v37, 1 }
  0x39   :  { %v189_v5 = vadd.f32 %v188_v46, %v142_v43  ;;  %v165_v31 = vrot.slane %v164_v13, 4  ;;  %v97_v35 = vadd.f32 %v96_v21, %v95_v58  ;;  %v73_v57 = vadd.f32 %v72_v41, %v71_v27 }
  0x3a   :  { %v178_v36 = vrot.slane %v177_v2, 4  ;;  %v85_v39 = vrot.slane %v84_v6, 1  ;;  %v154_v59 = vrot.slane %v153_v42, 2  ;;  %v112_v53 = vadd.f32 %v111_v51, %v110_v37 }
  0x3b   :  { %v190_v25 = vadd.f32 %v189_v5, %v144_v3  ;;  %v166_v43 = vadd.f32 %v165_v31, %v164_v13  ;;  %v98_v46 = vrot.slane %v97_v35, 1  ;;  %v849_v9 = vmul.f32 0.015625, %v73_v57 }
  0x3c   :  { %v179_v49 = vadd.f32 %v178_v36, %v177_v2  ;;  %v86_v63 = vadd.f32 %v85_v39, %v84_v6  ;;  %v155_v58 = vadd.f32 %v154_v59, %v153_v42  ;;  %v855_v23 = vmul.f32 0.015625, %v112_v53 }
  0x3d   :  { %v191_v10 = vrot.slane %v190_v25, 4  ;;  %v167_v3 = vrot.slane %v166_v43, 2  ;;  %v99_v47 = vadd.f32 %v98_v46, %v97_v35  ;;  %v201_v39 = vmul.f32 %v849_v9, %v849_v9 }
  0x3e   :  { %v180_v5 = vrot.slane %v179_v49, 2  ;;  %v851_v21 = vmul.f32 0.015625, %v86_v63  ;;  %v204_v36 = vmul.f32 %v855_v23, %v855_v23 }
  0x3f   :  { %v192_v54 = vadd.f32 %v191_v10, %v190_v25  ;;  %v168_v1 = vadd.f32 %v167_v3, %v166_v43  ;;  %v853_v13 = vmul.f32 0.015625, %v99_v47  ;;  %v156_v25 = vrot.slane %v155_v58, 1 }
  0x40   :  { %v181_v7 = vadd.f32 %v180_v5, %v179_v49  ;;  %v202_v29 = vmul.f32 %v851_v21, %v851_v21  ;;  %v205_v10 = vmul.f32 64.0, %v201_v39  ;;  %v208_v51 = vmul.f32 64.0, %v204_v36 }
  0x41   :  { %v193_v62 = vrot.slane %v192_v54, 2  ;;  %v169_v27 = vrot.slane %v168_v1, 1  ;;  %v203_v31 = vmul.f32 %v853_v13, %v853_v13  ;;  %v157_v37 = vadd.f32 %v156_v25, %v155_v58 }
  0x42   :  { %v182_v6 = vrot.slane %v181_v7, 1  ;;  %v206_v42 = vmul.f32 64.0, %v202_v29 }
  0x43   :  { %v194_v2 = vadd.f32 %v193_v62, %v192_v54  ;;  %v170_v41 = vadd.f32 %v169_v27, %v168_v1  ;;  %v207_v46 = vmul.f32 64.0, %v203_v31  ;;  %v209_v54 = vsub.f32 %v157_v37, %v205_v10 }
  0x44   :  { %v183_v43 = vadd.f32 %v182_v6, %v181_v7 }
  0x45   :  { %v195_v35 = vrot.slane %v194_v2, 1  ;;  %v210_v57 = vsub.f32 %v170_v41, %v206_v42  ;;  %v213_v3 = vmul.f32 0.015873017, %v209_v54 }
  0x46   :  { %v211_v59 = vsub.f32 %v183_v43, %v207_v46 }
  0x47   :  { %v196_v49 = vadd.f32 %v195_v35, %v194_v2  ;;  %v214_v47 = vmul.f32 0.015873017, %v210_v57  ;;  %v217_v62 = vmax.f32 %v213_v3, 0.0  ;;  %v286_v3 = vsub.f32 %v713_v30, %v855_v23 }
  0x48   :  { %v215_v5 = vmul.f32 0.015873017, %v211_v59  ;;  %v272_v30 = vsub.f32 %v719_v34, %v851_v21  ;;  %v275_v34 = vsub.f32 %v764_v60, %v849_v9  ;;  %v289_v60 = vsub.f32 %v752_v52, %v853_v13 }
  0x49   :  { %v212_v63 = vsub.f32 %v196_v49, %v208_v51  ;;  %v218_v33 = vmax.f32 %v214_v47, 0.0  ;;  %537 = vrsqrt.f32 %v217_v62  ;;  %vm223_vm0 = vcmp.eq.f32.partialorder %v217_v62, inf }
  0x4a   :  { %v219_v26 = vmax.f32 %v215_v5, 0.0  ;;  %v226_v29 = vand.u32 2147483648, %v217_v62  ;;  %vm225_vm3 = vcmp.eq.f32.partialorder %v217_v62, 0.0 }
  0x4b   :  { %v216_v53 = vmul.f32 0.015873017, %v212_v63  ;;  %539 = vrsqrt.f32 %v218_v33  ;;  %vm230_vm1 = vcmp.eq.f32.partialorder %v218_v33, inf  ;;  %v233_v35 = vand.u32 2147483648, %v218_v33 }
  0x4c   :  { %541 = vrsqrt.f32 %v219_v26  ;;  %vm237_vm2 = vcmp.eq.f32.partialorder %v219_v26, inf  ;;  %vm232_vm5 = vcmp.eq.f32.partialorder %v218_v33, 0.0  ;;  %v240_v37 = vand.u32 2147483648, %v219_v26 }
  0x4d   :  { %v220_v16 = vmax.f32 %v216_v53, 0.0  ;;  %vm239_vm6 = vcmp.eq.f32.partialorder %v219_v26, 0.0  ;;  %v265_v53 = vsub.f32 %v671_v11, %v849_v9  ;;  %v288_v11 = vsub.f32 %v731_v40, %v855_v23 }
  0x4e   :  { %v291_v40 = vsub.f32 %v774_v4, %v853_v13 }
  0x4f   :  { %543 = vrsqrt.f32 %v220_v16  ;;  %vm244_vm4 = vcmp.eq.f32.partialorder %v220_v16, inf  ;;  %v247_v41 = vand.u32 2147483648, %v220_v16  ;;  %vm246_vm7 = vcmp.eq.f32.partialorder %v220_v16, 0.0 }
  0x53   :  { %v538_v58 = vpop.eup %537 }
  0x54   :  { %v222_v25 = vmul.f32 %v538_v58, %v217_v62  ;;  %v287_v58 = vsub.f32 %v728_v38, %v853_v13  ;;  %v276_v38 = vsub.f32 %v769_v0, %v851_v21  ;;  %v290_v0 = vsub.f32 %v759_v56, %v855_v23 }
  0x55   :  { %v540_v1 = vpop.eup %539 }
  0x56   :  { %v542_v7 = vpop.eup %541  ;;  %v229_v39 = vmul.f32 %v540_v1, %v218_v33  ;;  %v224_v31 = vsel %vm223_vm0, %v217_v62, %v222_v25  ;;  %v266_v62 = vsub.f32 %v678_v14, %v851_v21  ;;  %v267_v14 = vsub.f32 %v673_v12, %v849_v9 }
  0x57   :  { %v236_v27 = vmul.f32 %v542_v7, %v219_v26  ;;  %v227_v42 = vsel %vm225_vm3, %v226_v29, %v224_v31  ;;  %v292_v12 = vsub.f32 %v779_v8, %v855_v23  ;;  %v279_v8 = vsub.f32 %v804_v45, %v849_v9  ;;  %v1036_v29 = vld [vmem:[#allocation10_spill] sm:$0xff]  ;;  %v1037_v45 = vld [vmem:[#allocation11_spill] sm:$0xff] }
  0x58   :  { %v231_v36 = vsel %vm230_vm1, %v218_v33, %v229_v39  ;;  %v249_v54 = vadd.f32 1e-06, %v227_v42  ;;  %v269_v33 = vsub.f32 %v695_v22, %v849_v9  ;;  %v281_v22 = vsub.f32 %v685_v17, %v853_v13  ;;  %v1034_v39 = vld [vmem:[#allocation8_spill] sm:$0xff] }
  0x59   :  { %v544_v2 = vpop.eup %543  ;;  %v238_v10 = vsel %vm237_vm2, %v219_v26, %v236_v27  ;;  %v234_v46 = vsel %vm232_vm5, %v233_v35, %v231_v36  ;;  %v270_v26 = vsub.f32 %v699_v24, %v851_v21  ;;  %v282_v24 = vsub.f32 %v689_v19, %v855_v23  ;;  %v1035_v27 = vld [vmem:[#allocation9_spill] sm:$0xff] }
  0x5a   :  { %v243_v6 = vmul.f32 %v544_v2, %v220_v16  ;;  %v241_v49 = vsel %vm239_vm6, %v240_v37, %v238_v10  ;;  %v250_v57 = vadd.f32 1e-06, %v234_v46  ;;  %545 = vrcp.f32 %v249_v54 }
  0x5b   :  { %v251_v59 = vadd.f32 1e-06, %v241_v49  ;;  %v268_v17 = vsub.f32 %v680_v15, %v851_v21  ;;  %v283_v19 = vsub.f32 %v687_v18, %v853_v13  ;;  %v273_v18 = vsub.f32 %v738_v44, %v849_v9 }
  0x5c   :  { %v245_v43 = vsel %vm244_vm4, %v220_v16, %v243_v6  ;;  %547 = vrcp.f32 %v250_v57  ;;  %v285_v16 = vsub.f32 %v709_v28, %v853_v13  ;;  %v271_v28 = vsub.f32 %v716_v32, %v849_v9 }
  0x5d   :  { %v248_v51 = vsel %vm246_vm7, %v247_v41, %v245_v43  ;;  %549 = vrcp.f32 %v251_v59  ;;  %v284_v32 = vsub.f32 %v691_v20, %v855_v23  ;;  %v274_v20 = vsub.f32 %v745_v48, %v851_v21 }
  0x5e   :  { %v252_v63 = vadd.f32 1e-06, %v248_v51  ;;  %v280_v2 = vsub.f32 %v809_v50, %v851_v21  ;;  %v295_v25 = vsub.f32 %v814_v55, %v853_v13  ;;  %v296_v44 = vsub.f32 %v819_v61, %v855_v23 }
  0x5f   :  { %v277_v52 = vsub.f32 %v1034_v39, %v849_v9  ;;  %v278_v56 = vsub.f32 %v1035_v27, %v851_v21  ;;  %v293_v6 = vsub.f32 %v1036_v29, %v853_v13  ;;  %v294_v31 = vsub.f32 %v1037_v45, %v855_v23 }
  0x60   :  { %551 = vrcp.f32 %v252_v63 }
  0x64   :  { %v546_v1 = vpop.eup %545 }
  0x65   :  { %v301_v35 = vmul.f32 %v546_v1, %v269_v33  ;;  %v297_v36 = vmul.f32 %v546_v1, %v265_v53  ;;  %v303_v55 = vmul.f32 %v546_v1, %v271_v28  ;;  %v299_v37 = vmul.f32 %v546_v1, %v267_v14 }
  0x66   :  { %v548_v4 = vpop.eup %547  ;;  %v307_v59 = vmul.f32 %v546_v1, %v275_v34  ;;  %v959_v14 = vmul.f32 %v546_v1, %v277_v52 }
  0x67   :  { %v550_v48 = vpop.eup %549  ;;  %v302_v10 = vmul.f32 %v548_v4, %v270_v26  ;;  %v298_v61 = vmul.f32 %v548_v4, %v266_v62  ;;  %v304_v41 = vmul.f32 %v548_v4, %v272_v30  ;;  %v300_v42 = vmul.f32 %v548_v4, %v268_v17 }
  0x68   :  { %v317_v21 = vmul.f32 %v550_v48, %v285_v16  ;;  %v313_v46 = vmul.f32 %v550_v48, %v281_v22  ;;  %v319_v49 = vmul.f32 %v550_v48, %v287_v58  ;;  %v315_v13 = vmul.f32 %v550_v48, %v283_v19 }
  0x69   :  { %v308_v63 = vmul.f32 %v548_v4, %v276_v38  ;;  %v323_v33 = vmul.f32 %v550_v48, %v291_v40  ;;  %v939_v26 = vmul.f32 %v546_v1, %v273_v18  ;;  %v941_v62 = vmul.f32 %v548_v4, %v274_v20 }
  0x6a   :  { %v552_v50 = vpop.eup %551  ;;  %v943_v28 = vmul.f32 %v550_v48, %v289_v60  ;;  %v955_v58 = vmul.f32 %v550_v48, %v295_v25  ;;  %v961_v17 = vmul.f32 %v548_v4, %v278_v56  ;;  %v963_v19 = vmul.f32 %v550_v48, %v293_v6 }
  0x6b   :  { %v318_v51 = vmul.f32 %v552_v50, %v286_v3  ;;  %v314_v54 = vmul.f32 %v552_v50, %v282_v24  ;;  %v320_v23 = vmul.f32 %v552_v50, %v288_v11  ;;  %v316_v57 = vmul.f32 %v552_v50, %v284_v32 }
  0x6c   :  { %v324_v53 = vmul.f32 %v552_v50, %v292_v12  ;;  %v945_v30 = vmul.f32 %v552_v50, %v290_v0  ;;  %v951_v3 = vmul.f32 %v546_v1, %v279_v8  ;;  %v953_v24 = vmul.f32 %v548_v4, %v280_v2 }
  0x6d   :  { %v957_v11 = vmul.f32 %v552_v50, %v296_v44  ;;  %v965_v32 = vmul.f32 %v552_v50, %v294_v31 }
  0x94   :  { %v873_v47 = vpop.permute.xlu1 %341  ;;  %v875_v5 = vpop.permute.xlu0 %331 }
  0x95   :  { %v369_v18 = vmul.f32 %v875_v5, %v297_v36  ;;  %v370_v20 = vmul.f32 %v875_v5, %v298_v61  ;;  %v385_v60 = vmul.f32 %v875_v5, %v313_v46  ;;  %v386_v0 = vmul.f32 %v875_v5, %v314_v54 }
  0x96   :  { %v373_v5 = vmul.f32 %v873_v47, %v301_v35  ;;  %v374_v45 = vmul.f32 %v873_v47, %v302_v10  ;;  %v389_v31 = vmul.f32 %v873_v47, %v317_v21  ;;  %v390_v50 = vmul.f32 %v873_v47, %v318_v51 }
  0x98   :  { %v909_v15 = vpop.permute.xlu1 %346  ;;  %v337_v7 = vpop.permute.xlu0 %336 }
  0x99   :  { %v371_v34 = vmul.f32 %v337_v7, %v299_v37  ;;  %v372_v38 = vmul.f32 %v337_v7, %v300_v42  ;;  %v387_v40 = vmul.f32 %v337_v7, %v315_v13  ;;  %v388_v12 = vmul.f32 %v337_v7, %v316_v57 }
  0x9a   :  { %v375_v7 = vmul.f32 %v909_v15, %v303_v55  ;;  %v376_v56 = vmul.f32 %v909_v15, %v304_v41  ;;  %v391_v29 = vmul.f32 %v909_v15, %v319_v49  ;;  %v392_v6 = vmul.f32 %v909_v15, %v320_v23 }
  0x9c   :  { %v935_v43 = vpop.permute.xlu1 %356  ;;  %v937_v9 = vpop.permute.xlu0 %351 }
  0x9d   :  { %v379_v10 = vmul.f32 %v935_v43, %v307_v59  ;;  %v380_v21 = vmul.f32 %v935_v43, %v308_v63  ;;  %v395_v47 = vmul.f32 %v935_v43, %v323_v33  ;;  %v396_v13 = vmul.f32 %v935_v43, %v324_v53 }
  0x9e   :  { %v377_v51 = vmul.f32 %v937_v9, %v939_v26  ;;  %v378_v54 = vmul.f32 %v937_v9, %v941_v62  ;;  %v393_v23 = vmul.f32 %v937_v9, %v943_v28  ;;  %v394_v57 = vmul.f32 %v937_v9, %v945_v30 }
  0xa0   :  { %v947_v16 = vpop.permute.xlu1 %366  ;;  %v949_v22 = vpop.permute.xlu0 %361 }
  0xa1   :  { %v383_v9 = vmul.f32 %v947_v16, %v951_v3  ;;  %v384_v28 = vmul.f32 %v947_v16, %v953_v24  ;;  %v399_v30 = vmul.f32 %v947_v16, %v955_v58  ;;  %v381_v3 = vmul.f32 %v949_v22, %v959_v14 }
  0xa2   :  { %v382_v24 = vmul.f32 %v949_v22, %v961_v17  ;;  %v397_v58 = vmul.f32 %v949_v22, %v963_v19 }
  0xa4   :  { %v417_v1 = vpop.permute.xlu1 %416  ;;  %v412_v8 = vpop.permute.xlu0 %411 }
  0xa5   :  { %v451_v4 = vadd.f32 %v417_v1, %v371_v34  ;;  %v452_v2 = vadd.f32 %v417_v1, %v372_v38  ;;  %v467_v25 = vadd.f32 %v417_v1, %v387_v40  ;;  %v468_v44 = vadd.f32 %v417_v1, %v388_v12 }
  0xa6   :  { %v449_v48 = vadd.f32 %v412_v8, %v369_v18  ;;  %v450_v39 = vadd.f32 %v412_v8, %v370_v20  ;;  %v465_v52 = vadd.f32 %v412_v8, %v385_v60  ;;  %v466_v27 = vadd.f32 %v412_v8, %v386_v0 }
  0xa7   :  { %483 = vst [vmem:[#allocation5 + $0x10] sm:$0xff] %v451_v4  ;;  %484 = vst [vmem:[#allocation5 + $0x18] sm:$0xff] %v452_v2  ;;  %v400_v12 = vmul.f32 %v947_v16, %v957_v11  ;;  %v398_v16 = vmul.f32 %v949_v22, %v965_v32 }
  0xa8   :  { %499 = vst [vmem:[#allocation5 + $0x90] sm:$0xff] %v467_v25  ;;  %500 = vst [vmem:[#allocation5 + $0x98] sm:$0xff] %v468_v44  ;;  %v427_v36 = vpop.permute.xlu1 %426  ;;  %v422_v55 = vpop.permute.xlu0 %421 }
  0xa9   :  { %481 = vst [vmem:[#allocation5] sm:$0xff] %v449_v48  ;;  %482 = vst [vmem:[#allocation5 + $0x8] sm:$0xff] %v450_v39  ;;  %v455_v37 = vadd.f32 %v427_v36, %v375_v7  ;;  %v456_v15 = vadd.f32 %v427_v36, %v376_v56  ;;  %v471_v61 = vadd.f32 %v427_v36, %v391_v29 }
  0xaa   :  { %497 = vst [vmem:[#allocation5 + $0x80] sm:$0xff] %v465_v52  ;;  %498 = vst [vmem:[#allocation5 + $0x88] sm:$0xff] %v466_v27  ;;  %v472_v41 = vadd.f32 %v427_v36, %v392_v6  ;;  %v453_v42 = vadd.f32 %v422_v55, %v373_v5  ;;  %v454_v46 = vadd.f32 %v422_v55, %v374_v45 }
  0xab   :  { %v469_v49 = vadd.f32 %v422_v55, %v389_v31  ;;  %v470_v35 = vadd.f32 %v422_v55, %v390_v50  ;;  %487 = vst [vmem:[#allocation5 + $0x30] sm:$0xff] %v455_v37  ;;  %488 = vst [vmem:[#allocation5 + $0x38] sm:$0xff] %v456_v15 }
  0xac   :  { %503 = vst [vmem:[#allocation5 + $0xb0] sm:$0xff] %v471_v61  ;;  %504 = vst [vmem:[#allocation5 + $0xb8] sm:$0xff] %v472_v41  ;;  %v437_v43 = vpop.permute.xlu1 %436  ;;  %v432_v59 = vpop.permute.xlu0 %431 }
  0xad   :  { %485 = vst [vmem:[#allocation5 + $0x20] sm:$0xff] %v453_v42  ;;  %486 = vst [vmem:[#allocation5 + $0x28] sm:$0xff] %v454_v46  ;;  %v459_v63 = vadd.f32 %v437_v43, %v379_v10  ;;  %v460_v33 = vadd.f32 %v437_v43, %v380_v21  ;;  %v475_v53 = vadd.f32 %v437_v43, %v395_v47 }
  0xae   :  { %501 = vst [vmem:[#allocation5 + $0xa0] sm:$0xff] %v469_v49  ;;  %502 = vst [vmem:[#allocation5 + $0xa8] sm:$0xff] %v470_v35  ;;  %v476_v34 = vadd.f32 %v437_v43, %v396_v13  ;;  %v457_v26 = vadd.f32 %v432_v59, %v377_v51  ;;  %v458_v38 = vadd.f32 %v432_v59, %v378_v54 }
  0xaf   :  { %v473_v40 = vadd.f32 %v432_v59, %v393_v23  ;;  %v474_v62 = vadd.f32 %v432_v59, %v394_v57  ;;  %491 = vst [vmem:[#allocation5 + $0x50] sm:$0xff] %v459_v63  ;;  %492 = vst [vmem:[#allocation5 + $0x58] sm:$0xff] %v460_v33 }
  0xb0   :  { %507 = vst [vmem:[#allocation5 + $0xd0] sm:$0xff] %v475_v53  ;;  %508 = vst [vmem:[#allocation5 + $0xd8] sm:$0xff] %v476_v34  ;;  %v447_v18 = vpop.permute.xlu1 %446  ;;  %v442_v20 = vpop.permute.xlu0 %441 }
  0xb1   :  { %489 = vst [vmem:[#allocation5 + $0x40] sm:$0xff] %v457_v26  ;;  %490 = vst [vmem:[#allocation5 + $0x48] sm:$0xff] %v458_v38  ;;  %v463_v11 = vadd.f32 %v447_v18, %v383_v9  ;;  %v464_v60 = vadd.f32 %v447_v18, %v384_v28  ;;  %v479_v0 = vadd.f32 %v447_v18, %v399_v30 }
  0xb2   :  { %505 = vst [vmem:[#allocation5 + $0xc0] sm:$0xff] %v473_v40  ;;  %506 = vst [vmem:[#allocation5 + $0xc8] sm:$0xff] %v474_v62  ;;  %v480_v1 = vadd.f32 %v447_v18, %v400_v12  ;;  %v461_v8 = vadd.f32 %v442_v20, %v381_v3  ;;  %v462_v4 = vadd.f32 %v442_v20, %v382_v24 }
  0xb3   :  { %v477_v2 = vadd.f32 %v442_v20, %v397_v58  ;;  %v478_v25 = vadd.f32 %v442_v20, %v398_v16  ;;  %495 = vst [vmem:[#allocation5 + $0x70] sm:$0xff] %v463_v11  ;;  %496 = vst [vmem:[#allocation5 + $0x78] sm:$0xff] %v464_v60 }
  0xb4   :  { %511 = vst [vmem:[#allocation5 + $0xf0] sm:$0xff] %v479_v0  ;;  %512 = vst [vmem:[#allocation5 + $0xf8] sm:$0xff] %v480_v1 }
  0xb5   :  { %493 = vst [vmem:[#allocation5 + $0x60] sm:$0xff] %v461_v8  ;;  %494 = vst [vmem:[#allocation5 + $0x68] sm:$0xff] %v462_v4 }
  0xb6   :  { %509 = vst [vmem:[#allocation5 + $0xe0] sm:$0xff] %v477_v2  ;;  %510 = vst [vmem:[#allocation5 + $0xe8] sm:$0xff] %v478_v25 }
  0xb7   :  { %586 = shalt.err (!%p583_p12)
}
  0xb8   :  { %s587_s7 = scalar_lea.hbm %s1025_s3, 4096 }
  0xb9   :  { %p588_p13 = scmp.ne.s32.totalorder %s1025_s3, %s587_s7  ;;  %p591_p0 = scmp.lt.u32.totalorder %s587_s7, %s1025_s3 }
  0xbb   :  { %p593_p1 = pnand %p591_p0, %p588_p13 }
  0xbd   :  { %596 = shalt.err (!%p593_p1)
}
  0xbe   :  { %524 = dma.vmem_to_hbm [thread:$0]  %s519_s4, 4096, %s1025_s3, [#allocation4], %s602_s22, %s602_s22, %s603_s23  }
  0xbf   :  { %599 = dma.done.wait [#allocation4], 4096  }
  0xc0   :  { %600 = vsyncadd [#allocation4], 4294963200 }
  0xc1   :  { %528 = vsyncpa [#allocation3], 1 }
  0xc2   :  { %529 = vsyncpa [#allocation4], 1 }

</bundles_post_ra>
